<compile_context>
chip_gen: v6e
topology: v6e:2x2x1
jax: 0.10.0
libtpu: 0.0.40
codegen_flags: <defaults>
</compile_context>

<pallas_src>
import jax
import jax.numpy as jnp
from jax.experimental import pallas as pl
from jax.experimental.pallas import tpu as pltpu


# ----------------------------------------------------------------------------
# Helpers
# ----------------------------------------------------------------------------
def _round_up(x, m):
    return (x + m - 1) // m * m


def _pick_tile_n(n, cap=2048):
    """Row tile: multiple of 8 (f32 sublanes), ~ceil(n/2) so the parallel grid
    axis has >=2 steps for mid-size batches (v7x dual-TC), capped at 2048."""
    half = _round_up(-(-n // 2), 8)
    return max(8, min(cap, half))


def _vmem_limit_bytes(tile_n, e, h, num_row_io):
    """Scoped-VMEM request from the actual footprint (double-buffered row tiles
    + resident weights + f32 intermediates), with generous headroom."""
    row_tiles = 2 * num_row_io * tile_n * e * 4           # double-buffered in/out tiles
    weights = 2 * (2 * e * h * 2 + (h + e) * 4)           # bf16 W1/W2 + f32 biases (x2 buf)
    interm = 2 * tile_n * h * 4                           # f32 hidden activations
    est = 2 * (row_tiles + weights + interm)              # 2x headroom
    return int(min(100 * 1024 * 1024, max(16 * 1024 * 1024, est)))


# ----------------------------------------------------------------------------
# Pallas kernels: fused Linear(E,128) -> ReLU -> Linear(128,E)
# ----------------------------------------------------------------------------
def _mlp_body(x, w1_ref, b1_ref, w2_ref, b2_ref):
    # bf16 MXU operands, f32 accumulation; bias + ReLU in f32 on the VPU.
    h = jnp.dot(x.astype(jnp.bfloat16), w1_ref[...],
                preferred_element_type=jnp.float32)
    h = jnp.maximum(h + b1_ref[...], 0.0)
    y = jnp.dot(h.astype(jnp.bfloat16), w2_ref[...],
                preferred_element_type=jnp.float32)
    return y + b2_ref[...]


def _mlp_kernel(x_ref, w1_ref, b1_ref, w2_ref, b2_ref, o_ref):
    # x: (tn,E) f32  w1: (E,H) bf16  b1: (1,H) f32  w2: (H,E) bf16  b2: (1,E) f32
    o_ref[...] = _mlp_body(x_ref[...], w1_ref, b1_ref, w2_ref, b2_ref
                           ).astype(o_ref.dtype)


def _mlp_virtual_kernel(x_ref, d_ref, w1_ref, b1_ref, w2_ref, b2_ref,
                        o1_ref, o2_ref):
    # d = noise * std (precomputed); points2 = points + d is fused here so the
    # wrapper never materializes a stacked (2N, E) batch.
    x1 = x_ref[...]
    x2 = x1 + d_ref[...]
    o1_ref[...] = _mlp_body(x1, w1_ref, b1_ref, w2_ref, b2_ref).astype(o1_ref.dtype)
    o2_ref[...] = _mlp_body(x2, w1_ref, b1_ref, w2_ref, b2_ref).astype(o2_ref.dtype)


# ----------------------------------------------------------------------------
# Wrappers
# ----------------------------------------------------------------------------
def linear_matrix_pallas(points, w1_b, b1_row, w2_b, b2_row, *, tile_n=None):
    """Linear(E,128) -> ReLU -> Linear(128,E), one pipelined Pallas call.

    Expects pre-prepared params (bf16 weights, (1,.) f32 biases); see
    prepare_mlp_params. No input padding / output slicing: rows are independent,
    so the ragged last block's out-of-bounds tail rows are never written back.
    """
    n, e = points.shape
    h = w1_b.shape[1]
    if tile_n is None:
        tile_n = _pick_tile_n(n)

    row_spec = pl.BlockSpec((tile_n, e), lambda i: (i, 0))          # x / out tiles
    weight_specs = [
        pl.BlockSpec((e, h), lambda i: (0, 0)),                     # W1 (resident)
        pl.BlockSpec((1, h), lambda i: (0, 0)),                     # b1
        pl.BlockSpec((h, e), lambda i: (0, 0)),                     # W2 (resident)
        pl.BlockSpec((1, e), lambda i: (0, 0)),                     # b2
    ]

    return pl.pallas_call(
        _mlp_kernel,
        out_shape=jax.ShapeDtypeStruct((n, e), points.dtype),
        grid_spec=pltpu.PrefetchScalarGridSpec(
            num_scalar_prefetch=0,
            grid=(pl.cdiv(n, tile_n),),
            in_specs=[row_spec] + weight_specs,
            out_specs=row_spec,
        ),
        compiler_params=pltpu.CompilerParams(
            dimension_semantics=("parallel",),       # megacore sharding on v7x
            vmem_limit_bytes=_vmem_limit_bytes(tile_n, e, h, num_row_io=2),
        ),
    )(points, w1_b, b1_row, w2_b, b2_row)


def linear_matrix_virtual_pallas(points, scaled_noise, w1_b, b1_row, w2_b, b2_row,
                                 *, tile_n=None):
    """Both 'virtual' views in ONE launch: out1 = MLP(points),
    out2 = MLP(points + scaled_noise). Weights DMA'd once; no (2N,E) concat."""
    n, e = points.shape
    h = w1_b.shape[1]
    if tile_n is None:
        tile_n = _pick_tile_n(n)

    row_spec = pl.BlockSpec((tile_n, e), lambda i: (i, 0))
    weight_specs = [
        pl.BlockSpec((e, h), lambda i: (0, 0)),
        pl.BlockSpec((1, h), lambda i: (0, 0)),
        pl.BlockSpec((h, e), lambda i: (0, 0)),
        pl.BlockSpec((1, e), lambda i: (0, 0)),
    ]
    out_sd = jax.ShapeDtypeStruct((n, e), points.dtype)

    return pl.pallas_call(
        _mlp_virtual_kernel,
        out_shape=(out_sd, out_sd),
        grid_spec=pltpu.PrefetchScalarGridSpec(
            num_scalar_prefetch=0,
            grid=(pl.cdiv(n, tile_n),),
            in_specs=[row_spec, row_spec] + weight_specs,
            out_specs=(row_spec, row_spec),
        ),
        compiler_params=pltpu.CompilerParams(
            dimension_semantics=("parallel",),
            vmem_limit_bytes=_vmem_limit_bytes(tile_n, e, h, num_row_io=4),
        ),
    )(points, scaled_noise, w1_b, b1_row, w2_b, b2_row)


# ----------------------------------------------------------------------------
# SCCLMatrix (JAX version): params + forward
# ----------------------------------------------------------------------------
def prepare_mlp_params(w1, b1, w2, b2):
    """One-time preprocessing, hoisted out of the hot path: bf16 weights
    (MXU-native, halves weight DMA bytes), f32 biases reshaped to (1, .)."""
    return {
        "w1_mxu": w1.astype(jnp.bfloat16),
        "b1_row": b1.reshape(1, -1).astype(jnp.float32),
        "w2_mxu": w2.astype(jnp.bfloat16),
        "b2_row": b2.reshape(1, -1).astype(jnp.float32),
    }


def init_scclmatrix_params(key, emb_size, n_clusters=4, hidden=128):
    """Deterministic parameter init mimicking nn.Linear defaults (uniform)."""
    k1, k2, k3, k4, k5 = jax.random.split(key, 5)
    lim1 = 1.0 / jnp.sqrt(emb_size)
    lim2 = 1.0 / jnp.sqrt(hidden)
    params = {
        # stored pre-transposed as (in, out) so the kernel does x @ W
        "w1": jax.random.uniform(k1, (emb_size, hidden), jnp.float32, -lim1, lim1),
        "b1": jax.random.uniform(k2, (hidden,), jnp.float32, -lim1, lim1),
        "w2": jax.random.uniform(k3, (hidden, emb_size), jnp.float32, -lim2, lim2),
        "b2": jax.random.uniform(k4, (emb_size,), jnp.float32, -lim2, lim2),
        "cluster_centers": jax.random.normal(k5, (n_clusters, emb_size), jnp.float32),
    }
    params.update(prepare_mlp_params(params["w1"], params["b1"],
                                     params["w2"], params["b2"]))
    return params


def scclmatrix_forward(params, points, task_type, *, noise_key=None,
                       linear_transformation=True):
    """Mirrors SCCLMatrix.forward."""
    mlp = (params["w1_mxu"], params["b1_row"], params["w2_mxu"], params["b2_row"])

    if task_type == "evaluate":
        if linear_transformation:
            return linear_matrix_pallas(points, *mlp)
        return points

    elif task_type == "virtual":
        # torch.no_grad() noise-injection glue. std is a full-batch reduction, so
        # it stays in plain JAX; the per-row add points + noise*std is fused into
        # the kernel. NOTE: batch=1 gives NaN std (same as torch.var unbiased).
        noise = jax.random.normal(noise_key, points.shape, points.dtype)
        std = jnp.sqrt(jnp.var(points, axis=0, ddof=1)) / 8.0
        scaled_noise = noise * std
        if linear_transformation:
            return linear_matrix_virtual_pallas(points, scaled_noise, *mlp)
        return points, points + scaled_noise

    else:
        raise NotImplementedError


# ----------------------------------------------------------------------------
# Pure-JAX reference for correctness
# ----------------------------------------------------------------------------
def _linear_matrix_ref(points, w1, b1, w2, b2):
    h = jnp.maximum(points @ w1 + b1, 0.0)
    return h @ w2 + b2


if __name__ == "__main__":
    key = jax.random.PRNGKey(0)
    pkey, xkey, nkey = jax.random.split(key, 3)

    batch = 8
    emb_size = 32

    params = init_scclmatrix_params(pkey, emb_size)
    points = jax.random.normal(xkey, (batch, emb_size), jnp.float32)

    # bf16 matmul operands -> loosen tolerance vs the pure-f32 reference.
    ATOL = 5e-2
    RTOL = 5e-2

    # task_type == 'evaluate'
    out_eval = scclmatrix_forward(params, points, "evaluate")
    out_eval = jax.block_until_ready(out_eval)
    ref = _linear_matrix_ref(points, params["w1"], params["b1"],
                             params["w2"], params["b2"])
    assert out_eval.shape == (batch, emb_size)
    assert jnp.allclose(out_eval, ref, atol=ATOL, rtol=RTOL)

    # task_type == 'virtual' (single fused launch producing both views)
    tp1, tp2 = scclmatrix_forward(params, points, "virtual", noise_key=nkey)
    tp1 = jax.block_until_ready(tp1)
    tp2 = jax.block_until_ready(tp2)
    assert tp1.shape == (batch, emb_size) and tp2.shape == (batch, emb_size)
    assert jnp.allclose(tp1, ref, atol=ATOL, rtol=RTOL)

    noise = jax.random.normal(nkey, points.shape, points.dtype)
    std = jnp.sqrt(jnp.var(points, axis=0, ddof=1)) / 8.0
    points2 = points + noise * std
    ref2 = _linear_matrix_ref(points2, params["w1"], params["b1"],
                              params["w2"], params["b2"])
    assert jnp.allclose(tp2, ref2, atol=ATOL, rtol=RTOL)

    # Exercise the multi-tile + ragged-last-block path (no pad/slice in wrapper).
    big_points = jax.random.normal(xkey, (1000, emb_size), jnp.float32)
    big_out = jax.block_until_ready(
        scclmatrix_forward(params, big_points, "evaluate"))
    big_ref = _linear_matrix_ref(big_points, params["w1"], params["b1"],
                                 params["w2"], params["b2"])
    assert big_out.shape == big_points.shape
    assert jnp.allclose(big_out, big_ref, atol=ATOL, rtol=RTOL)

    print("KERNEL_OK")
</pallas_src>

<mosaic_0001>
module attributes {stable_mosaic.version = 11 : i64} {
  func.func @_mlp_kernel(%arg0: i32, %arg1: memref<8x32xf32, #tpu.memory_space<vmem>>, %arg2: memref<32x128xbf16, #tpu.memory_space<vmem>>, %arg3: memref<1x128xf32, #tpu.memory_space<vmem>>, %arg4: memref<128x32xbf16, #tpu.memory_space<vmem>>, %arg5: memref<1x32xf32, #tpu.memory_space<vmem>>, %arg6: memref<8x32xf32, #tpu.memory_space<vmem>>) attributes {dimension_semantics = [#tpu.dimension_semantics<parallel>], iteration_bounds = array<i64: 1>, scalar_prefetch = 0 : i64, scratch_operands = 0 : i64, tpu.core_type = #tpu.core_type<tc>, window_params = [{transform_indices = @transform_0, window_bounds = array<i64: 8, 32>}, {pipeline_mode = #tpu.pipeline_mode<synchronous>, transform_indices = @transform_1, window_bounds = array<i64: 32, 128>}, {pipeline_mode = #tpu.pipeline_mode<synchronous>, transform_indices = @transform_2, window_bounds = array<i64: 1, 128>}, {pipeline_mode = #tpu.pipeline_mode<synchronous>, transform_indices = @transform_3, window_bounds = array<i64: 128, 32>}, {pipeline_mode = #tpu.pipeline_mode<synchronous>, transform_indices = @transform_4, window_bounds = array<i64: 1, 32>}, {transform_indices = @transform_5, window_bounds = array<i64: 8, 32>}]} {
    %c0 = arith.constant 0 : index
    %c0_0 = arith.constant 0 : index
    %0 = vector.load %arg1[%c0, %c0_0] : memref<8x32xf32, #tpu.memory_space<vmem>>, vector<8x32xf32>
    %1 = arith.truncf %0 : vector<8x32xf32> to vector<8x32xbf16>
    %c0_1 = arith.constant 0 : index
    %c0_2 = arith.constant 0 : index
    %2 = vector.load %arg2[%c0_1, %c0_2] : memref<32x128xbf16, #tpu.memory_space<vmem>>, vector<32x128xbf16>
    %cst = arith.constant dense<0.000000e+00> : vector<8x128xf32>
    %3 = tpu.matmul %1, %2, %cst {dimension_numbers = #tpu.dot_dimension_numbers<[1], [0], [0], [1], [0, 0, 1, 1], [], []>} : vector<8x32xbf16>, vector<32x128xbf16>, vector<8x128xf32> -> vector<8x128xf32>
    %c0_3 = arith.constant 0 : index
    %c0_4 = arith.constant 0 : index
    %4 = vector.load %arg3[%c0_3, %c0_4] : memref<1x128xf32, #tpu.memory_space<vmem>>, vector<1x128xf32>
    %5 = vector.broadcast %4 : vector<1x128xf32> to vector<8x128xf32>
    %6 = arith.addf %3, %5 : vector<8x128xf32>
    %cst_5 = arith.constant 0.000000e+00 : f32
    %7 = vector.broadcast %cst_5 : f32 to vector<8x128xf32>
    %8 = arith.maximumf %6, %7 : vector<8x128xf32>
    %9 = arith.truncf %8 : vector<8x128xf32> to vector<8x128xbf16>
    %c0_6 = arith.constant 0 : index
    %c0_7 = arith.constant 0 : index
    %10 = vector.load %arg4[%c0_6, %c0_7] : memref<128x32xbf16, #tpu.memory_space<vmem>>, vector<128x32xbf16>
    %cst_8 = arith.constant dense<0.000000e+00> : vector<8x32xf32>
    %11 = tpu.matmul %9, %10, %cst_8 {dimension_numbers = #tpu.dot_dimension_numbers<[1], [0], [0], [1], [0, 0, 1, 1], [], []>} : vector<8x128xbf16>, vector<128x32xbf16>, vector<8x32xf32> -> vector<8x32xf32>
    %c0_9 = arith.constant 0 : index
    %c0_10 = arith.constant 0 : index
    %12 = vector.load %arg5[%c0_9, %c0_10] : memref<1x32xf32, #tpu.memory_space<vmem>>, vector<1x32xf32>
    %13 = vector.broadcast %12 : vector<1x32xf32> to vector<8x32xf32>
    %14 = arith.addf %11, %13 : vector<8x32xf32>
    %c0_11 = arith.constant 0 : index
    %c0_12 = arith.constant 0 : index
    %15 = vector.load %arg6[%c0_11, %c0_12] : memref<8x32xf32, #tpu.memory_space<vmem>>, vector<8x32xf32>
    tpu.vector_store %arg6[%c0_11, %c0_12], %14 {strides = array<i32>} : memref<8x32xf32, #tpu.memory_space<vmem>>, vector<8x32xf32>,
    return
  }
  func.func @transform_0(%arg0: i32) -> (i32, i32) {
    %c0_i32 = arith.constant 0 : i32
    %c0_i32_0 = arith.constant 0 : i32
    return %arg0, %c0_i32 : i32, i32
  }
  func.func @transform_1(%arg0: i32) -> (i32, i32) {
    %c0_i32 = arith.constant 0 : i32
    %c0_i32_0 = arith.constant 0 : i32
    %c0_i32_1 = arith.constant 0 : i32
    return %c0_i32, %c0_i32_0 : i32, i32
  }
  func.func @transform_2(%arg0: i32) -> (i32, i32) {
    %c0_i32 = arith.constant 0 : i32
    %c0_i32_0 = arith.constant 0 : i32
    %c0_i32_1 = arith.constant 0 : i32
    return %c0_i32, %c0_i32_0 : i32, i32
  }
  func.func @transform_3(%arg0: i32) -> (i32, i32) {
    %c0_i32 = arith.constant 0 : i32
    %c0_i32_0 = arith.constant 0 : i32
    %c0_i32_1 = arith.constant 0 : i32
    return %c0_i32, %c0_i32_0 : i32, i32
  }
  func.func @transform_4(%arg0: i32) -> (i32, i32) {
    %c0_i32 = arith.constant 0 : i32
    %c0_i32_0 = arith.constant 0 : i32
    %c0_i32_1 = arith.constant 0 : i32
    return %c0_i32, %c0_i32_0 : i32, i32
  }
  func.func @transform_5(%arg0: i32) -> (i32, i32) {
    %c0_i32 = arith.constant 0 : i32
    %c0_i32_0 = arith.constant 0 : i32
    return %arg0, %c0_i32 : i32, i32
  }
}

</mosaic_0001>

<bundles_post_ra>
// kernel: tpu_custom_call.1
= control target key start
LH: loop header
LB: loop body
LE: loop exit
PB: predicated region body
PF: predicated region fallthrough
CT: control target
= control target key end

     0   :  { %v307_v1 = vmov 0.0   ;;  %vm308_vm0 = vmmov 0   ;;  %vm47_vm1 = vcmask 261120   ;;  %s384_s0 = inlined_call_operand.vmem [shape: f32[8,32], index: 0, kind: input, shape index: {}]   ;;  %s385_s1 = inlined_call_operand.vmem [shape: bf16[32,128], index: 1, kind: input, shape index: {}]   ;;  %s386_s2 = inlined_call_operand.vmem [shape: f32[1,128], index: 2, kind: input, shape index: {}]   ;;  %s387_s3 = inlined_call_operand.vmem [shape: bf16[128,32], index: 3, kind: input, shape index: {}]   ;;  %s388_s4 = inlined_call_operand.vmem [shape: f32[1,32], index: 4, kind: input, shape index: {}]   ;;  %s389_s5 = inlined_call_operand.hbm [shape: f32[8,32], index: 5, kind: output, shape index: {}]  }
   0x1   :  { %v275_v0 = vld [vmem:[%s385_s1 + $0x8] sm:$0xff]   ;;  %244 = vmatprep.subr.bf16.mxu0 %v307_v1  ;;  %v276_v2 = vld [vmem:[%s385_s1] sm:$0xff]   ;;  %252 = vmatprep.subr.bf16.mxu1 %v307_v1  ;;  %v277_v4 = vld [vmem:[%s387_s3 + $0x38] sm:$0xff]  }
   0x2   :  { %245 = vmatpush3.bf16.msra.mxu0 %v275_v0  ;;  %248 = vmatprep.mubr.msk.bf16.mxu0 %vm308_vm0, %v307_v1  ;;  %v22_v3 = vld [vmem:[%s384_s0] sm:$0xff]  ;;  %v278_v6 = vld [vmem:[%s387_s3 + $0x30] sm:$0xff]   ;;  %v279_v7 = vld [vmem:[%s387_s3 + $0x28] sm:$0xff]  }
   0x3   :  { %246 = vmatprep.subr.bf16.mxu0 %v307_v1  ;;  %268 = vmatprep.mubr.msk.bf16.mxu1 %vm308_vm0, %v307_v1  ;;  %v23_v5 = vpack.c.bf16 %v22_v3, %v22_v3 }
   0x4   :  { %253 = vmatpush3.bf16.msra.mxu1 %v277_v4 }
   0x5   :  { %254 = vmatprep.subr.bf16.mxu1 %v307_v1 }
   0x6   :  { %247 = vmatpush3.bf16.msra.mxu0 %v276_v2 }
   0x8   :  { %255 = vmatpush3.bf16.msra.mxu1 %v278_v6 }
   0x9   :  { %249 = vmatmul.mubr.msk.bf16.vlgmr.msra.gmra.mxu0 %vm47_vm1, %v23_v5  ;;  %256 = vmatprep.subr.bf16.mxu1 %v307_v1 }
   0xa   :  { %10 = vsyncpa [#allocation3], 0  ;;  %v280_v8 = vld [vmem:[%s387_s3 + $0x20] sm:$0xff]   ;;  %v281_v9 = vld [vmem:[%s387_s3 + $0x18] sm:$0xff]   ;;  %s309_s17 = smov [#allocation2]  }
   0xb   :  { %v282_v10 = vld [vmem:[%s387_s3 + $0x10] sm:$0xff]   ;;  %v283_v11 = vld [vmem:[%s387_s3 + $0x8] sm:$0xff]   ;;  %v284_v12 = vld [vmem:[%s387_s3] sm:$0xff]   ;;  %s211_s18 = sshll.u32 %s309_s17, 4  ;;  %s212_s18 = int_to_ptr.vmem [resolvable:$true] %s211_s18 }
   0xc   :  { %257 = vmatpush3.bf16.msra.mxu1 %v279_v7  ;;  %v219_v13 = vld [vmem:[%s386_s2] ss:$0 sm:$0xff]  ;;  %s285_s2 = scalar_lea.vmem %s212_s18, 128  ;;  %p290_p1 = scmp.lt.s32.totalorder %s212_s18, %s212_s18 }
   0xd   :  { %258 = vmatprep.subr.bf16.mxu1 %v307_v1  ;;  %v223_v21 = vld [vmem:[%s388_s4] ss:$0 sm:$0xff]  ;;  %p286_p0 = scmp.ne.s32.totalorder %s212_s18, %s285_s2  ;;  %p291_p2 = scmp.lt.s32.totalorder %s285_s2, %s285_s2 }
   0xf   :  { %p292_p3 = por %p291_p2, %p290_p1 }
  0x10   :  { %259 = vmatpush3.bf16.msra.mxu1 %v280_v8 }
  0x11   :  { %260 = vmatprep.subr.bf16.mxu1 %v307_v1  ;;  %p293_p4 = pnand %p292_p3, %p286_p0 }
  0x14   :  { %261 = vmatpush3.bf16.msra.mxu1 %v281_v9 }
  0x15   :  { %262 = vmatprep.subr.bf16.mxu1 %v307_v1 }
  0x18   :  { %263 = vmatpush3.bf16.msra.mxu1 %v282_v10 }
  0x19   :  { %264 = vmatprep.subr.bf16.mxu1 %v307_v1 }
  0x1c   :  { %265 = vmatpush3.bf16.msra.mxu1 %v283_v11 }
  0x1d   :  { %266 = vmatprep.subr.bf16.mxu1 %v307_v1 }
  0x20   :  { %267 = vmatpush3.bf16.msra.mxu1 %v284_v12 }
  0xc9   :  { %v85_v14 = vpop.f32.mrf.mxu0 }
  0xca   :  { %v86_v15 = vadd.f32 %v219_v13, %v85_v14 }
  0xcb   :  { %v250_v16 = vpop.f32.mrf.mxu0 }
  0xcc   :  { %v91_v17 = vmax.f32 %v86_v15, 0.0 }
  0xcd   :  { %v88_v18 = vpop.f32.mrf.mxu0 }
  0xce   :  { %v92_v19 = vpack.c.bf16 %v91_v17, %v91_v17 }
  0xcf   :  { %v251_v20 = vpop.f32.mrf.mxu0 }
  0xd0   :  { %269 = vmatmul.mubr.bf16.vlgmr.msra.gmra.mxu1 %v92_v19 }
 0x190   :  { %v198_v22 = vpop.f32.mrf.mxu1 }
 0x191   :  { %v199_v23 = vadd.f32 %v223_v21, %v198_v22 }
 0x192   :  { %v270_v24 = vpop.f32.mrf.mxu1 }
 0x193   :  { %204 = vst.msk [vmem:[#allocation2] sm:$0xff] %vm47_vm1, %v199_v23 }
 0x194   :  { %v201_v25 = vpop.f32.mrf.mxu1 }
 0x195   :  { %296 = shalt.err (!%p293_p4)
}
 0x196   :  { %214 = dma.vmem_to_hbm [thread:$0]  %s212_s18, 128, %s389_s5, [#allocation3]   ;;  %v271_v26 = vpop.f32.mrf.mxu1 }
 0x197   :  { %305 = dma.done.wait [#allocation3], 128  }
 0x198   :  { %306 = vsyncadd [#allocation3], 4294967168 }
 0x199   :  { %218 = vsyncpa [#allocation3], 1 }

</bundles_post_ra>
